<compile_context>
chip_gen: v7x
topology: tpu7x:2x2x1
jax: 0.10.0
libtpu: 0.0.40
codegen_flags: <defaults>
</compile_context>

<pallas_src>
import functools

import jax
import jax.numpy as jnp
from jax.experimental import pallas as pl
from jax.experimental.pallas import tpu as pltpu


def _mlloss_kernel(x_ref, d_ref, out_ref, acc_ref, *, threshold: float,
                   eps: float, num_maps: int, maps_per_block: int):
    s = pl.program_id(0)

    @pl.when(s == 0)
    def _init():
        acc_ref[0] = jnp.float32(0.0)

    x = x_ref[...].astype(jnp.float32)            # (TL, B, B), upcast in vregs
    d = d_ref[...]                                # (B, B) f32, resident in VMEM
    thr = jnp.float32(threshold)

    # w = diff where x passes the threshold, else 0 (single select, no bool->f32
    # convert + extra multiply).
    w = jnp.where(x >= thr, d[None, :, :], jnp.float32(0.0))   # (TL, B, B)

    # Per-map reductions, kept 2-D: (TL, B, B) -> (TL, B) -> (TL, 1).
    num = jnp.sum(jnp.sum(x * w, axis=2), axis=1, keepdims=True)
    den = jnp.sum(jnp.sum(w, axis=2), axis=1, keepdims=True)
    sim = num / (den + jnp.float32(eps))
    partial = jnp.maximum(sim - thr, jnp.float32(0.0))          # (TL, 1)

    # Mask maps beyond L (partial last block along the L axis).
    idx = (s * maps_per_block
           + jax.lax.broadcasted_iota(jnp.int32, (maps_per_block, 1), 0))
    valid = idx < num_maps
    acc_ref[0] += jnp.sum(jnp.where(valid, partial, jnp.float32(0.0)))

    @pl.when(s == pl.num_programs(0) - 1)
    def _finalize():
        out_ref[0] = acc_ref[0]


def mlloss(inp: jax.Array, target: jax.Array, sim_threshold: float,
           eps: float = 1e-6, invert: bool = False,
           max_block_bytes: int = 4 * 1024 * 1024) -> jax.Array:
    """Pallas TPU implementation of MLLoss.forward.

    inp:    [L, B, B] stack of similarity matrices (any float dtype; streamed
            in its native dtype, upcast to f32 inside the kernel).
    target: [B] binary labels (bool / 0-1 ints).
    Returns a scalar f32 loss.
    """
    del invert  # unused by the reference forward
    assert inp.ndim == 3 and inp.shape[1] == inp.shape[2] == target.shape[0]
    L, B, _ = inp.shape

    # diff matrix computed once in the wrapper (tiny), DMA'd once and resident.
    t = target.astype(jnp.bool_)
    diff = jnp.logical_xor(t[:, None], t[None, :]).astype(jnp.float32)  # [B, B]

    # Block TL maps per grid step; aim for ~max_block_bytes per input block.
    map_bytes = B * B * jnp.dtype(inp.dtype).itemsize
    tl = max(1, min(L, max_block_bytes // max(map_bytes, 1)))
    num_steps = pl.cdiv(L, tl)

    # VMEM budget: double-buffered input block + resident diff + slack.
    block_bytes = tl * map_bytes
    needed = 2 * block_bytes + diff.size * 4 + (2 << 20)
    vmem_limit = int(min(48 * 1024 * 1024, max(16 * 1024 * 1024, needed)))

    kernel = functools.partial(
        _mlloss_kernel, threshold=float(sim_threshold), eps=float(eps),
        num_maps=L, maps_per_block=tl)

    loss = pl.pallas_call(
        kernel,
        out_shape=jax.ShapeDtypeStruct((1,), jnp.float32),
        grid=(num_steps,),
        in_specs=[
            # TL maps per step; full-extent (B, B) last dims -> no (8,128)
            # divisibility requirement and no padding copies in HBM.
            pl.BlockSpec((tl, B, B), lambda s: (s, 0, 0)),
            # diff: same block every step -> fetched once, stays resident.
            pl.BlockSpec((B, B), lambda s: (0, 0)),
        ],
        out_specs=pl.BlockSpec(memory_space=pltpu.SMEM),
        scratch_shapes=[pltpu.SMEM((1,), jnp.float32)],
        compiler_params=pltpu.CompilerParams(
            dimension_semantics=("arbitrary",),   # loss carried across steps
            vmem_limit_bytes=vmem_limit,
        ),
    )(inp, diff)
    return loss[0]


def _reference(inp, target, threshold, eps=1e-6):
    """Pure-jnp transcription of the PyTorch forward."""
    t = target.astype(bool)
    diff = jnp.logical_xor(t[:, None], t[None, :]).astype(jnp.float32)
    loss = jnp.float32(0.0)
    for m in inp:
        m = m.astype(jnp.float32)
        mask = (m >= threshold).astype(jnp.float32)
        sim = jnp.sum(m * diff * mask) / (jnp.sum(diff * mask) + eps)
        loss = loss + jnp.maximum(sim - threshold, 0.0)
    return loss


if __name__ == "__main__":
    key = jax.random.PRNGKey(0)
    k1, k2, k3 = jax.random.split(key, 3)
    L, B = 4, 16
    sim_threshold = 0.5

    inp = jax.random.uniform(k1, (L, B, B), dtype=jnp.float32,
                             minval=-1.0, maxval=1.0)
    target = (jax.random.uniform(k2, (B,)) > 0.5).astype(jnp.int32)

    loss = mlloss(inp, target, sim_threshold)
    jax.block_until_ready(loss)
    ref = _reference(inp, target, sim_threshold)
    assert jnp.allclose(loss, ref, atol=1e-5, rtol=1e-5), (loss, ref)

    # Exercise multi-step grid (partial last block + masking) and native-dtype
    # (bf16) streaming with a deliberately small block cap.
    L2 = 10
    inp2 = jax.random.uniform(k3, (L2, B, B), dtype=jnp.float32,
                              minval=-1.0, maxval=1.0).astype(jnp.bfloat16)
    loss2 = mlloss(inp2, target, sim_threshold,
                   max_block_bytes=3 * B * B * inp2.dtype.itemsize)
    jax.block_until_ready(loss2)
    ref2 = _reference(inp2, target, sim_threshold)
    assert jnp.allclose(loss2, ref2, atol=1e-4, rtol=1e-4), (loss2, ref2)

    print("KERNEL_OK")
</pallas_src>

<mosaic_0001>
module attributes {stable_mosaic.version = 11 : i64} {
  func.func @_mlloss_kernel(%arg0: i32, %arg1: memref<4x16x16xf32, #tpu.memory_space<vmem>>, %arg2: memref<16x16xf32, #tpu.memory_space<vmem>>, %arg3: memref<1xf32, #tpu.memory_space<smem>>, %arg4: memref<1xf32, #tpu.memory_space<smem>>) attributes {dimension_semantics = [#tpu.dimension_semantics<arbitrary>], iteration_bounds = array<i64: 1>, scalar_prefetch = 0 : i64, scratch_operands = 1 : i64, tpu.core_type = #tpu.core_type<tc>, window_params = [{transform_indices = @transform_0, window_bounds = array<i64: 4, 16, 16>}, {pipeline_mode = #tpu.pipeline_mode<synchronous>, transform_indices = @transform_1, window_bounds = array<i64: 16, 16>}, {transform_indices = @transform_2, window_bounds = array<i64: 1>}]} {
    %c0_i32 = arith.constant 0 : i32
    %0 = arith.cmpi eq, %arg0, %c0_i32 : i32
    %1 = arith.extui %0 : i1 to i32
    %c0_i32_0 = arith.constant 0 : i32
    %2 = arith.cmpi ne, %1, %c0_i32_0 : i32
    scf.if %2 {
      %cst_20 = arith.constant 0.000000e+00 : f32
      %c0_21 = arith.constant 0 : index
      %44 = memref.load %arg4[%c0_21] : memref<1xf32, #tpu.memory_space<smem>>
      memref.store %cst_20, %arg4[%c0_21] : memref<1xf32, #tpu.memory_space<smem>>
    } else {
    }
    %c0 = arith.constant 0 : index
    %c0_1 = arith.constant 0 : index
    %c0_2 = arith.constant 0 : index
    %3 = vector.load %arg1[%c0, %c0_1, %c0_2] : memref<4x16x16xf32, #tpu.memory_space<vmem>>, vector<4x16x16xf32>
    %c0_3 = arith.constant 0 : index
    %c0_4 = arith.constant 0 : index
    %4 = vector.load %arg2[%c0_3, %c0_4] : memref<16x16xf32, #tpu.memory_space<vmem>>, vector<16x16xf32>
    %cst = arith.constant 5.000000e-01 : f32
    %5 = vector.broadcast %cst : f32 to vector<4x16x16xf32>
    %6 = arith.cmpf oge, %3, %5 : vector<4x16x16xf32>
    %7 = vector.shape_cast %4 : vector<16x16xf32> to vector<1x16x16xf32>
    %cst_5 = arith.constant 0.000000e+00 : f32
    %8 = vector.shape_cast %7 : vector<1x16x16xf32> to vector<1x16x16xf32>
    %9 = vector.broadcast %8 : vector<1x16x16xf32> to vector<4x16x16xf32>
    %10 = vector.broadcast %cst_5 : f32 to vector<4x16x16xf32>
    %11 = arith.select %6, %9, %10 : vector<4x16x16xi1>, vector<4x16x16xf32>
    %12 = arith.mulf %3, %11 : vector<4x16x16xf32>
    %cst_6 = arith.constant dense<0.000000e+00> : vector<4x16xf32>
    %13 = vector.multi_reduction <add>, %12, %cst_6 [2] : vector<4x16x16xf32> to vector<4x16xf32>
    %cst_7 = arith.constant dense<0.000000e+00> : vector<4xf32>
    %14 = vector.multi_reduction <add>, %13, %cst_7 [1] : vector<4x16xf32> to vector<4xf32>
    %15 = vector.shape_cast %14 : vector<4xf32> to vector<4x1xf32>
    %cst_8 = arith.constant dense<0.000000e+00> : vector<4x16xf32>
    %16 = vector.multi_reduction <add>, %11, %cst_8 [2] : vector<4x16x16xf32> to vector<4x16xf32>
    %cst_9 = arith.constant dense<0.000000e+00> : vector<4xf32>
    %17 = vector.multi_reduction <add>, %16, %cst_9 [1] : vector<4x16xf32> to vector<4xf32>
    %18 = vector.shape_cast %17 : vector<4xf32> to vector<4x1xf32>
    %cst_10 = arith.constant 9.99999997E-7 : f32
    %19 = vector.broadcast %cst_10 : f32 to vector<4x1xf32>
    %20 = arith.addf %18, %19 : vector<4x1xf32>
    %21 = arith.divf %15, %20 : vector<4x1xf32>
    %cst_11 = arith.constant 5.000000e-01 : f32
    %22 = vector.broadcast %cst_11 : f32 to vector<4x1xf32>
    %23 = arith.subf %21, %22 : vector<4x1xf32>
    %cst_12 = arith.constant 0.000000e+00 : f32
    %24 = vector.broadcast %cst_12 : f32 to vector<4x1xf32>
    %25 = arith.maximumf %23, %24 : vector<4x1xf32>
    %c4_i32 = arith.constant 4 : i32
    %26 = arith.muli %arg0, %c4_i32 : i32
    %27 = tpu.iota {dimensions = array<i32: 0>} : vector<4x1xi32>
    %28 = vector.broadcast %26 : i32 to vector<4x1xi32>
    %29 = arith.addi %28, %27 : vector<4x1xi32>
    %c4_i32_13 = arith.constant 4 : i32
    %30 = vector.broadcast %c4_i32_13 : i32 to vector<4x1xi32>
    %31 = arith.cmpi slt, %29, %30 : vector<4x1xi32>
    %c0_14 = arith.constant 0 : index
    %32 = memref.load %arg4[%c0_14] : memref<1xf32, #tpu.memory_space<smem>>
    %cst_15 = arith.constant 0.000000e+00 : f32
    %33 = vector.broadcast %cst_15 : f32 to vector<4x1xf32>
    %34 = arith.select %31, %25, %33 : vector<4x1xi1>, vector<4x1xf32>
    %35 = vector.shape_cast %34 : vector<4x1xf32> to vector<1x4x1xf32>
    %cst_16 = arith.constant dense<0.000000e+00> : vector<1xf32>
    %36 = vector.multi_reduction <add>, %35, %cst_16 [1, 2] : vector<1x4x1xf32> to vector<1xf32>
    %37 = vector.shape_cast %36 : vector<1xf32> to vector<1x1x1xf32>
    %38 = vector.extract %37[0, 0, 0] : f32 from vector<1x1x1xf32>
    %39 = arith.addf %32, %38 : f32
    %c0_17 = arith.constant 0 : index
    %40 = memref.load %arg4[%c0_17] : memref<1xf32, #tpu.memory_space<smem>>
    memref.store %39, %arg4[%c0_17] : memref<1xf32, #tpu.memory_space<smem>>
    %c0_i32_18 = arith.constant 0 : i32
    %41 = arith.cmpi eq, %arg0, %c0_i32_18 : i32
    %42 = arith.extui %41 : i1 to i32
    %c0_i32_19 = arith.constant 0 : i32
    %43 = arith.cmpi ne, %42, %c0_i32_19 : i32
    scf.if %43 {
      %c0_20 = arith.constant 0 : index
      %44 = memref.load %arg4[%c0_20] : memref<1xf32, #tpu.memory_space<smem>>
      %c0_21 = arith.constant 0 : index
      %45 = memref.load %arg3[%c0_21] : memref<1xf32, #tpu.memory_space<smem>>
      memref.store %44, %arg3[%c0_21] : memref<1xf32, #tpu.memory_space<smem>>
    } else {
    }
    return
  }
  func.func @transform_0(%arg0: i32) -> (i32, i32, i32) {
    %c0_i32 = arith.constant 0 : i32
    %c0_i32_0 = arith.constant 0 : i32
    %c0_i32_1 = arith.constant 0 : i32
    return %arg0, %c0_i32, %c0_i32_0 : i32, i32, i32
  }
  func.func @transform_1(%arg0: i32) -> (i32, i32) {
    %c0_i32 = arith.constant 0 : i32
    %c0_i32_0 = arith.constant 0 : i32
    %c0_i32_1 = arith.constant 0 : i32
    return %c0_i32, %c0_i32_0 : i32, i32
  }
  func.func @transform_2(%arg0: i32) -> i32 {
    %c0_i32 = arith.constant 0 : i32
    %c0_i32_0 = arith.constant 0 : i32
    return %c0_i32 : i32
  }
}

</mosaic_0001>

<bundles_post_ra>
// kernel: tpu_custom_call.1
= control target key start
LH: loop header
LB: loop body
LE: loop exit
PB: predicated region body
PF: predicated region fallthrough
CT: control target
= control target key end

     0   :  { %7 = vsyncpa [#allocation4], 0  ;;  %s450_s0 = inlined_call_operand.hbm [shape: f32[4,16,16], index: 0, kind: input, shape index: {}]   ;;  %s451_s1 = inlined_call_operand.hbm [shape: f32[16,16], index: 1, kind: input, shape index: {}]   ;;  %s452_s2 = inlined_call_operand.hbm [shape: f32[1], index: 2, kind: output, shape index: {}]  }
   0x1   :  { %8 = vsyncpa [#allocation7], 0 }
   0x2   :  { %9 = vsyncpa [#allocation5], 0  ;;  %s357_s9 = smov [#allocation3]   ;;  %s297_s13 = scalar_lea.hbm %s450_s0, 1024 }
   0x3   :  { %s15_s10 = sshll.u32 %s357_s9, 4  ;;  %p298_p0 = scmp.ne.s32.totalorder %s450_s0, %s297_s13  ;;  %s16_s10 = int_to_ptr.vmem [resolvable:$true] %s15_s10 }
   0x4   :  { %p301_p1 = scmp.lt.u32.totalorder %s297_s13, %s450_s0 }
   0x6   :  { %p303_p2 = pnand %p301_p1, %p298_p0 }
   0x8   :  { %306 = shalt.err (!%p303_p2)
}
   0x9   :  { %s307_s18 = scalar_lea.vmem %s16_s10, 1024  ;;  %p312_p4 = scmp.lt.s32.totalorder %s16_s10, %s16_s10 }
   0xa   :  { %p308_p3 = scmp.ne.s32.totalorder %s16_s10, %s307_s18  ;;  %p313_p5 = scmp.lt.s32.totalorder %s307_s18, %s307_s18 }
   0xc   :  { %p314_p6 = por %p313_p5, %p312_p4 }
   0xe   :  { %p315_p7 = pnand %p314_p6, %p308_p3 }
  0x10   :  { %318 = shalt.err (!%p315_p7)
}
  0x11   :  { %s358_s19 = smov 128   ;;  %s359_s20 = smov 8  }
  0x12   :  { %21 = dma.hbm_to_vmem [thread:$0]  %s450_s0, 1024, %s16_s10, [#allocation4], %s358_s19, %s358_s19, %s359_s20  }
  0x13   :  { %s360_s23 = smov [#allocation6]   ;;  %s319_s27 = scalar_lea.hbm %s451_s1, 256 }
  0x14   :  { %s27_s24 = sshll.u32 %s360_s23, 4  ;;  %p320_p8 = scmp.ne.s32.totalorder %s451_s1, %s319_s27  ;;  %s28_s24 = int_to_ptr.vmem [resolvable:$true] %s27_s24 }
  0x15   :  { %p323_p9 = scmp.lt.u32.totalorder %s319_s27, %s451_s1 }
  0x17   :  { %p325_p10 = pnand %p323_p9, %p320_p8 }
  0x19   :  { %328 = shalt.err (!%p325_p10)
}
  0x1a   :  { %s329_s4 = scalar_lea.vmem %s28_s24, 256  ;;  %p334_p12 = scmp.lt.s32.totalorder %s28_s24, %s28_s24 }
  0x1b   :  { %p330_p11 = scmp.ne.s32.totalorder %s28_s24, %s329_s4  ;;  %p335_p13 = scmp.lt.s32.totalorder %s329_s4, %s329_s4 }
  0x1d   :  { %p336_p0 = por %p335_p13, %p334_p12 }
  0x1f   :  { %p337_p1 = pnand %p336_p0, %p330_p11 }
  0x21   :  { %340 = shalt.err (!%p337_p1)
}
  0x22   :  { %33 = dma.hbm_to_vmem [thread:$0]  %s451_s1, 256, %s28_s24, [#allocation7], %s358_s19, %s358_s19, %s359_s20  }
  0x23   :  { %351 = dma.done.wait [#allocation4], 1024  }
  0x24   :  { %352 = vsyncadd [#allocation4], 4294966272 }
  0x25   :  { %353 = dma.done.wait [#allocation7], 256  }
  0x26   :  { %354 = vsyncadd [#allocation7], 4294967040  ;;  %v48_v0 = vld [vmem:[#allocation3 + $0x10] sm:$0xff]  ;;  %v54_v1 = vld [vmem:[#allocation6] sm:$0xff]  ;;  %vm80_vm0 = vcmask 130048   ;;  %v113_v42 = vlaneseq  ;;  %vm124_vm9 = vcmask 130112  }
  0x27   :  { %v46_v2 = vld [vmem:[#allocation3] sm:$0xff]  ;;  %vm58_vm1 = vcmp.ge.f32.partialorder %v48_v0, 0.5  ;;  %v49_v3 = vld [vmem:[#allocation3 + $0x18] sm:$0xff]  ;;  %v55_v4 = vld [vmem:[#allocation6 + $0x8] sm:$0xff]  ;;  %vm153_vm10 = vcmask 1041409   ;;  %vm155_vm11 = vcmask 1042434  }
  0x28   :  { %vm56_vm2 = vcmp.ge.f32.partialorder %v46_v2, 0.5  ;;  %v47_v5 = vld [vmem:[#allocation3 + $0x8] sm:$0xff]  ;;  %v66_v6 = vsel %vm58_vm1, %v54_v1, 0.0  ;;  %vm59_vm3 = vcmp.ge.f32.partialorder %v49_v3, 0.5  ;;  %v50_v9 = vld [vmem:[#allocation3 + $0x20] sm:$0xff]  ;;  %v53_v14 = vld [vmem:[#allocation3 + $0x38] sm:$0xff] }
  0x29   :  { %v64_v7 = vsel %vm56_vm2, %v54_v1, 0.0  ;;  %vm57_vm4 = vcmp.ge.f32.partialorder %v47_v5, 0.5  ;;  %v51_v8 = vld [vmem:[#allocation3 + $0x28] sm:$0xff]  ;;  %v170_v10 = vsel %vm80_vm0, %v66_v6, 0.0  ;;  %v67_v12 = vsel %vm59_vm3, %v55_v4, 0.0  ;;  %v52_v15 = vld [vmem:[#allocation3 + $0x30] sm:$0xff] }
  0x2a   :  { %v164_v11 = vsel %vm80_vm0, %v64_v7, 0.0  ;;  %171 = vadd.xlane.f32.xlu1 %v170_v10  ;;  %v65_v13 = vsel %vm57_vm4, %v55_v4, 0.0  ;;  %vm61_vm5 = vcmp.ge.f32.partialorder %v51_v8, 0.5  ;;  %vm60_vm6 = vcmp.ge.f32.partialorder %v50_v9, 0.5  ;;  %s341_s8 = scalar_lea.hbm %s452_s2, 16 }
  0x2b   :  { %165 = vadd.xlane.f32.xlu0 %v164_v11  ;;  %v173_v16 = vsel %vm80_vm0, %v67_v12, 0.0  ;;  %v167_v17 = vsel %vm80_vm0, %v65_v13, 0.0  ;;  %v69_v18 = vsel %vm61_vm5, %v55_v4, 0.0  ;;  %v68_v19 = vsel %vm60_vm6, %v54_v1, 0.0  ;;  %p342_p2 = scmp.ne.s32.totalorder %s452_s2, %s341_s8  ;;  %p345_p3 = scmp.lt.u32.totalorder %s341_s8, %s452_s2 }
  0x2c   :  { %vm63_vm7 = vcmp.ge.f32.partialorder %v53_v14, 0.5  ;;  %vm62_vm8 = vcmp.ge.f32.partialorder %v52_v15, 0.5  ;;  %v179_v20 = vsel %vm80_vm0, %v69_v18, 0.0  ;;  %v176_v21 = vsel %vm80_vm0, %v68_v19, 0.0 }
  0x2d   :  { %v71_v22 = vsel %vm63_vm7, %v55_v4, 0.0  ;;  %v70_v23 = vsel %vm62_vm8, %v54_v1, 0.0  ;;  %v72_v24 = vmul.f32 %v64_v7, %v46_v2  ;;  %v73_v27 = vmul.f32 %v65_v13, %v47_v5  ;;  %p347_p4 = pnand %p345_p3, %p342_p2 }
  0x2e   :  { %174 = vadd.xlane.f32.xlu1 %v173_v16  ;;  %v185_v25 = vsel %vm80_vm0, %v71_v22, 0.0  ;;  %v182_v26 = vsel %vm80_vm0, %v70_v23, 0.0  ;;  %v74_v28 = vmul.f32 %v66_v6, %v48_v0  ;;  %v75_v31 = vmul.f32 %v67_v12, %v49_v3 }
  0x2f   :  { %168 = vadd.xlane.f32.xlu0 %v167_v17  ;;  %v84_v29 = vsel %vm80_vm0, %v73_v27, 0.0  ;;  %v81_v30 = vsel %vm80_vm0, %v72_v24, 0.0  ;;  %v77_v34 = vmul.f32 %v69_v18, %v51_v8  ;;  %v76_v35 = vmul.f32 %v68_v19, %v50_v9 }
  0x30   :  { %v90_v32 = vsel %vm80_vm0, %v75_v31, 0.0  ;;  %v87_v33 = vsel %vm80_vm0, %v74_v28, 0.0  ;;  %v79_v38 = vmul.f32 %v71_v22, %v53_v14  ;;  %v78_v39 = vmul.f32 %v70_v23, %v52_v15 }
  0x31   :  { %v96_v36 = vsel %vm80_vm0, %v77_v34, 0.0  ;;  %v93_v37 = vsel %vm80_vm0, %v76_v35, 0.0  ;;  %v114_v43 = vand.u32 127, %v113_v42  ;;  %v417_v47 = vshrl.u32 %v113_v42, 7 }
  0x32   :  { %180 = vadd.xlane.f32.xlu1 %v179_v20  ;;  %v102_v40 = vsel %vm80_vm0, %v79_v38, 0.0  ;;  %v99_v41 = vsel %vm80_vm0, %v78_v39, 0.0  ;;  %vm157_vm12 = vcmask 1043459   ;;  %vm160_vm13 = vcmask 125952  }
  0x33   :  { %177 = vadd.xlane.f32.xlu0 %v176_v21  ;;  %v119_v44 = vadd.s32 4294967288, %v114_v43  ;;  %v117_v51 = vsub.s32 %v114_v43, %v417_v47  ;;  %vm249_vm14 = vcmp.lt.s32.totalorder %v417_v47, 4  ;;  %vm252_vm15 = vcmask 3072  }
  0x35   :  { %v122_v48 = vsub.s32 %v119_v44, %v417_v47 }
  0x36   :  { %186 = vadd.xlane.f32.xlu1 %v185_v25 }
  0x37   :  { %183 = vadd.xlane.f32.xlu0 %v182_v26 }
  0x3a   :  { %85 = vadd.xlane.f32.xlu1 %v84_v29 }
  0x3b   :  { %82 = vadd.xlane.f32.xlu0 %v81_v30 }
  0x3e   :  { %91 = vadd.xlane.f32.xlu1 %v90_v32 }
  0x3f   :  { %88 = vadd.xlane.f32.xlu0 %v87_v33 }
  0x42   :  { %97 = vadd.xlane.f32.xlu1 %v96_v36 }
  0x43   :  { %94 = vadd.xlane.f32.xlu0 %v93_v37 }
  0x46   :  { %103 = vadd.xlane.f32.xlu1 %v102_v40 }
  0x47   :  { %100 = vadd.xlane.f32.xlu0 %v99_v41 }
  0xb7   :  { %v172_v45 = vpop.xlane.xlu1 %171 }
  0xb8   :  { %v166_v46 = vpop.xlane.xlu0 %165  ;;  %v208_v56 = vrot.slane %v172_v45, %v117_v51 }
  0xb9   :  { %v199_v57 = vrot.slane %v166_v46, %v117_v51 }
  0xbb   :  { %v175_v49 = vpop.xlane.xlu1 %174 }
  0xbc   :  { %v169_v50 = vpop.xlane.xlu0 %168  ;;  %v212_v52 = vrot.slane %v175_v49, %v122_v48 }
  0xbd   :  { %v203_v53 = vrot.slane %v169_v50, %v122_v48 }
  0xbe   :  { %v213_v60 = vsel %vm124_vm9, %v212_v52, %v208_v56 }
  0xbf   :  { %v181_v54 = vpop.xlane.xlu1 %180  ;;  %v204_v61 = vsel %vm124_vm9, %v203_v53, %v199_v57 }
  0xc0   :  { %v178_v55 = vpop.xlane.xlu0 %177  ;;  %v221_v58 = vrot.slane %v181_v54, %v122_v48  ;;  %v232_v3 = vsel %vm153_vm10, %v213_v60, %v204_v61 }
  0xc1   :  { %v217_v59 = vrot.slane %v178_v55, %v117_v51 }
  0xc3   :  { %v222_v62 = vsel %vm124_vm9, %v221_v58, %v217_v59  ;;  %v187_v63 = vpop.xlane.xlu1 %186 }
  0xc4   :  { %v184_v0 = vpop.xlane.xlu0 %183  ;;  %v230_v1 = vrot.slane %v187_v63, %v122_v48  ;;  %v233_v5 = vsel %vm155_vm11, %v222_v62, %v232_v3 }
  0xc5   :  { %v226_v2 = vrot.slane %v184_v0, %v117_v51 }
  0xc7   :  { %v231_v4 = vsel %vm124_vm9, %v230_v1, %v226_v2  ;;  %v86_v6 = vpop.xlane.xlu1 %85 }
  0xc8   :  { %v83_v7 = vpop.xlane.xlu0 %82  ;;  %v234_v8 = vsel %vm157_vm12, %v231_v4, %v233_v5  ;;  %v123_v16 = vrot.slane %v86_v6, %v122_v48 }
  0xc9   :  { %v236_v9 = vsel %vm160_vm13, %v234_v8, 0.0  ;;  %v118_v17 = vrot.slane %v83_v7, %v117_v51 }
  0xca   :  { %237 = vadd.xlane.f32.xlu0 %v236_v9 }
  0xcb   :  { %v92_v10 = vpop.xlane.xlu1 %91  ;;  %v125_v24 = vsel %vm124_vm9, %v123_v16, %v118_v17 }
  0xcc   :  { %v89_v11 = vpop.xlane.xlu0 %88  ;;  %v133_v12 = vrot.slane %v92_v10, %v122_v48 }
  0xcd   :  { %v129_v13 = vrot.slane %v89_v11, %v117_v51 }
  0xcf   :  { %v98_v14 = vpop.xlane.xlu1 %97  ;;  %v134_v20 = vsel %vm124_vm9, %v133_v12, %v129_v13 }
  0xd0   :  { %v95_v15 = vpop.xlane.xlu0 %94  ;;  %v142_v18 = vrot.slane %v98_v14, %v122_v48  ;;  %v154_v27 = vsel %vm153_vm10, %v134_v20, %v125_v24 }
  0xd1   :  { %v138_v19 = vrot.slane %v95_v15, %v117_v51 }
  0xd3   :  { %v143_v21 = vsel %vm124_vm9, %v142_v18, %v138_v19  ;;  %v104_v22 = vpop.xlane.xlu1 %103 }
  0xd4   :  { %v101_v23 = vpop.xlane.xlu0 %100  ;;  %v151_v25 = vrot.slane %v104_v22, %v122_v48  ;;  %v156_v29 = vsel %vm155_vm11, %v143_v21, %v154_v27 }
  0xd5   :  { %v147_v26 = vrot.slane %v101_v23, %v117_v51 }
  0xd7   :  { %v152_v28 = vsel %vm124_vm9, %v151_v25, %v147_v26 }
  0xd8   :  { %v158_v30 = vsel %vm157_vm12, %v152_v28, %v156_v29 }
  0xd9   :  { %v161_v31 = vsel %vm160_vm13, %v158_v30, 0.0 }
  0xda   :  { %162 = vadd.xlane.f32.xlu1 %v161_v31 }
 0x157   :  { %v238_v32 = vpop.xlane.xlu0 %237 }
 0x158   :  { %v239_v33 = vadd.f32 1e-06, %v238_v32 }
 0x15a   :  { %295 = vrcp.f32 %v239_v33 }
 0x164   :  { %v296_v34 = vpop.eup %295 }
 0x167   :  { %v163_v35 = vpop.xlane.xlu1 %162 }
 0x168   :  { %v241_v36 = vmul.f32 %v296_v34, %v163_v35 }
 0x16a   :  { %v287_v37 = vadd.f32 -0.5, %v241_v36 }
 0x16c   :  { %v243_v38 = vmax.f32 %v287_v37, 0.0 }
 0x16e   :  { %v251_v39 = vsel %vm249_vm14, %v243_v38, 0.0 }
 0x16f   :  { %v253_v40 = vsel %vm252_vm15, %v251_v39, 0.0 }
 0x170   :  { %254 = vadd.xlane.f32.xlu0 %v253_v40 }
 0x1fd   :  { %v255_v41 = vpop.xlane.xlu0 %254 }
 0x1fe   :  { %v256_v42 = vrot.slane %v255_v41, 4 }
 0x200   :  { %v257_v43 = vadd.f32 %v256_v42, %v255_v41 }
 0x202   :  { %v258_v44 = vrot.slane %v257_v43, 2 }
 0x204   :  { %v259_v45 = vadd.f32 %v258_v44, %v257_v43 }
 0x206   :  { %v260_v46 = vrot.slane %v259_v45, 1 }
 0x208   :  { %v261_v48 = vadd.f32 %v260_v46, %v259_v45 }
 0x20a   :  { %288 = vpush %v261_v48 }
 0x23b   :  { %s289_s1 = spop %288 }
 0x23c   :  { %271 = sst [smem:[#allocation8]] %s289_s1 }
 0x23d   :  { %350 = shalt.err (!%p347_p4)
}
 0x23e   :  { %s361_s13 = smov [#allocation8]  }
 0x23f   :  { %279 = dma.smem_to_hbm %s361_s13, 16, %s452_s2, [#allocation5]  }
 0x240   :  { %355 = dma.done.wait [#allocation5], 16  }
 0x241   :  { %356 = vsyncadd [#allocation5], 4294967280 }
 0x242   :  { %283 = sfence }
 0x243   :  { %284 = vsyncpa [#allocation4], 1 }
 0x244   :  { %285 = vsyncpa [#allocation7], 1 }
 0x245   :  { %286 = vsyncpa [#allocation5], 1 }

</bundles_post_ra>
